<compile_context>
chip_gen: v6e
topology: v6e:2x2x1
jax: 0.10.0
libtpu: 0.0.40
codegen_flags: <defaults>
</compile_context>

<pallas_src>
import functools

import jax
import jax.numpy as jnp
import numpy as np
from jax.experimental import pallas as pl
from jax.experimental.pallas import tpu as pltpu


def autopad(kernel_size: int, padding):
    # Matches the PyTorch helper: SAME-style padding when padding is None.
    return kernel_size // 2 if padding is None else padding


def _round_up(x: int, m: int) -> int:
    return (x + m - 1) // m * m


def _dwconv_bn_relu_kernel(x_ref, w_ref, scale_ref, bias_ref, wmask_ref,
                           o_ref, xp_ref, *, H, W, K, pad, margin):
    # x_ref:     (Rb, H*W)            rows = flattened (n, c), lanes = flattened (h, w)
    # w_ref:     (Rb, K*K)            per-row depthwise taps (row r uses channel r % C)
    # scale_ref: (Rb, 1)              fused BN scale = gamma / sqrt(var + eps)
    # bias_ref:  (Rb, 1)              fused BN bias  = beta - mean * scale
    # wmask_ref: (K, H*W)             column-validity mask per kw tap (W wrap-around)
    # o_ref:     (Rb, H*W)
    # xp_ref:    (Rb, H*W + 2*margin) VMEM scratch with zero halo margins
    Rb, L = o_ref.shape

    # Stage the row block into the zero-haloed scratch so that every (kh, kw)
    # tap below is a static slice of VMEM (halo handled fully in-kernel).
    # Margins are rewritten every grid step so correctness does not depend on
    # how the "parallel" row axis is sharded across TensorCores.
    xp_ref[:, :margin] = jnp.zeros((Rb, margin), jnp.float32)
    xp_ref[:, margin + L:] = jnp.zeros((Rb, margin), jnp.float32)
    xp_ref[:, margin:margin + L] = x_ref[...].astype(jnp.float32)

    wv = w_ref[...].astype(jnp.float32)   # (Rb, K*K)
    mv = wmask_ref[...]                   # (K, L)

    # One partial accumulator per kernel row (kh) -> independent FMA chains.
    partials = []
    for kh in range(K):
        dh = kh - pad
        acc = None
        for kw in range(K):
            dw = kw - pad
            off = dh * W + dw
            # tap[p] == x[p + off]; out-of-image rows land in the zero margin.
            tap = xp_ref[:, margin + off:margin + off + L]          # (Rb, L)
            if dw != 0:
                tap = tap * mv[kw:kw + 1, :]                        # mask W wrap
            term = tap * wv[:, kh * K + kw:kh * K + kw + 1]         # per-row weight
            acc = term if acc is None else acc + term
        partials.append(acc)

    y = partials[0]
    for part in partials[1:]:
        y = y + part

    # Fused BatchNorm (inference) + ReLU.
    y = y * scale_ref[...] + bias_ref[...]
    o_ref[...] = jnp.maximum(y, 0.0).astype(o_ref.dtype)


def dwconv_bn_relu(x_nchw, weight, gamma, beta, running_mean, running_var,
                   *, stride=1, padding=None, eps=1e-5):
    """Depthwise conv (groups=C) + BatchNorm2d (eval) + ReLU.

    x_nchw: (N, C, H, W); weight: (C, 1, K, K) PyTorch depthwise layout.
    """
    assert stride == 1, "stride=1 only in this kernel"
    N, C, H, W = x_nchw.shape
    K = weight.shape[-1]
    assert K % 2 == 1, "odd kernel_size only (even K needs asymmetric SAME pad)"
    pad = autopad(K, padding)

    L = H * W
    R = N * C

    # Free reshape (NCHW is contiguous): rows = (n, c), lanes = (h, w).
    x_flat = x_nchw.reshape(R, L)

    # Per-row conv taps and fused-BN affine parameters (tiny host-side prep).
    w_rows = jnp.tile(weight.reshape(C, K * K).astype(jnp.float32), (N, 1))   # (R, K*K)
    scale = gamma.astype(jnp.float32) / jnp.sqrt(running_var.astype(jnp.float32) + eps)
    bias = beta.astype(jnp.float32) - running_mean.astype(jnp.float32) * scale
    scale_rows = jnp.tile(scale.reshape(C, 1), (N, 1))                         # (R, 1)
    bias_rows = jnp.tile(bias.reshape(C, 1), (N, 1))                           # (R, 1)

    # Column-validity mask per kw tap (numpy constant, 0/1 floats), shape (K, L).
    cols = np.arange(L, dtype=np.int64) % W
    wmask = jnp.asarray(np.stack(
        [((cols + (kw - pad) >= 0) & (cols + (kw - pad) < W)).astype(np.float32)
         for kw in range(K)], axis=0))

    # Halo margin on the flattened spatial axis, rounded to a lane multiple so
    # the staging store into the scratch stays 128-aligned.
    margin = max(128, _round_up(pad * W + pad, 128))

    # Row-block sizing: keep 2x-buffered in/out blocks + scratch well under the
    # scoped-VMEM budget (safe on v5e/v6e/v7x).
    vmem_budget = 16 * 1024 * 1024
    bytes_per_row = 4 * (5 * L + 2 * margin)      # ~2x in, 2x out, 1x scratch
    max_rows = max(8, vmem_budget // bytes_per_row)
    if R <= max_rows:
        rb, r_pad = R, R
    else:
        rb = (max_rows // 8) * 8
        r_pad = _round_up(R, rb)

    if r_pad > R:
        extra = r_pad - R
        x_flat = jnp.pad(x_flat, ((0, extra), (0, 0)))
        w_rows = jnp.pad(w_rows, ((0, extra), (0, 0)))
        scale_rows = jnp.pad(scale_rows, ((0, extra), (0, 0)))
        bias_rows = jnp.pad(bias_rows, ((0, extra), (0, 0)))

    kernel = functools.partial(_dwconv_bn_relu_kernel,
                               H=H, W=W, K=K, pad=pad, margin=margin)

    out_flat = pl.pallas_call(
        kernel,
        out_shape=jax.ShapeDtypeStruct((r_pad, L), x_nchw.dtype),
        grid_spec=pltpu.PrefetchScalarGridSpec(
            num_scalar_prefetch=0,
            grid=(r_pad // rb,),
            in_specs=[
                pl.BlockSpec((rb, L), lambda r: (r, 0)),
                pl.BlockSpec((rb, K * K), lambda r: (r, 0)),
                pl.BlockSpec((rb, 1), lambda r: (r, 0)),
                pl.BlockSpec((rb, 1), lambda r: (r, 0)),
                pl.BlockSpec((K, L), lambda r: (0, 0)),
            ],
            out_specs=pl.BlockSpec((rb, L), lambda r: (r, 0)),
            scratch_shapes=[pltpu.VMEM((rb, L + 2 * margin), jnp.float32)],
        ),
        compiler_params=pltpu.CompilerParams(
            dimension_semantics=("parallel",),
            vmem_limit_bytes=32 * 1024 * 1024,
        ),
        cost_estimate=pl.CostEstimate(
            flops=int(2 * R * L * K * K + 4 * R * L),
            transcendentals=0,
            bytes_accessed=int(2 * R * L * jnp.dtype(x_nchw.dtype).itemsize
                               + R * (K * K + 2) * 4),
        ),
    )(x_flat, w_rows, scale_rows, bias_rows, wmask)

    return out_flat[:R].reshape(N, C, H, W)


def _reference(x_nchw, weight, gamma, beta, mean, var, eps=1e-5):
    # Pure-JAX reference: depthwise conv via lax.conv_general_dilated.
    C = x_nchw.shape[1]
    K = weight.shape[-1]
    pad = K // 2
    y = jax.lax.conv_general_dilated(
        x_nchw, weight, window_strides=(1, 1),
        padding=((pad, pad), (pad, pad)),
        feature_group_count=C,
        dimension_numbers=("NCHW", "OIHW", "NCHW"))
    scale = (gamma / jnp.sqrt(var + eps)).reshape(1, C, 1, 1)
    bias = (beta - mean * gamma / jnp.sqrt(var + eps)).reshape(1, C, 1, 1)
    return jnp.maximum(y * scale + bias, 0.0)


if __name__ == "__main__":
    # Module config: DWConv(in_channel=4, out_channels=4, kernel_size=3)
    # -> groups = gcd(4, 4) = 4 (true depthwise), autopad -> padding = 1.
    N, C, H, W, K = 2, 4, 16, 16, 3

    key = jax.random.PRNGKey(0)
    kx, kw, kg, kb, km, kv = jax.random.split(key, 6)

    x = jax.random.normal(kx, (N, C, H, W), dtype=jnp.float32)
    # Conv2d(bias=False) depthwise weight: (out_channels, in_channels/groups=1, K, K)
    weight = jax.random.normal(kw, (C, 1, K, K), dtype=jnp.float32) * 0.2
    # BatchNorm2d params / running stats (deterministic, non-trivial).
    gamma = 1.0 + 0.1 * jax.random.normal(kg, (C,), dtype=jnp.float32)
    beta = 0.1 * jax.random.normal(kb, (C,), dtype=jnp.float32)
    running_mean = 0.05 * jax.random.normal(km, (C,), dtype=jnp.float32)
    running_var = 1.0 + 0.1 * jax.random.uniform(kv, (C,), dtype=jnp.float32)

    out = dwconv_bn_relu(x, weight, gamma, beta, running_mean, running_var)
    out = jax.block_until_ready(out)

    ref = _reference(x, weight, gamma, beta, running_mean, running_var)
    np.testing.assert_allclose(np.asarray(out), np.asarray(ref),
                               rtol=1e-5, atol=1e-5)
    print("KERNEL_OK")
</pallas_src>

<mosaic_0001>
module attributes {stable_mosaic.version = 11 : i64} {
  func.func @_dwconv_bn_relu_kernel(%arg0: i32, %arg1: memref<8x256xf32, #tpu.memory_space<vmem>>, %arg2: memref<8x9xf32, #tpu.memory_space<vmem>>, %arg3: memref<8x1xf32, #tpu.memory_space<vmem>>, %arg4: memref<8x1xf32, #tpu.memory_space<vmem>>, %arg5: memref<3x256xf32, #tpu.memory_space<vmem>>, %arg6: memref<8x256xf32, #tpu.memory_space<vmem>>, %arg7: memref<8x512xf32, #tpu.memory_space<vmem>>) attributes {dimension_semantics = [#tpu.dimension_semantics<parallel>], iteration_bounds = array<i64: 1>, scalar_prefetch = 0 : i64, scratch_operands = 1 : i64, tpu.core_type = #tpu.core_type<tc>, window_params = [{transform_indices = @transform_0, window_bounds = array<i64: 8, 256>}, {transform_indices = @transform_1, window_bounds = array<i64: 8, 9>}, {transform_indices = @transform_2, window_bounds = array<i64: 8, 1>}, {transform_indices = @transform_3, window_bounds = array<i64: 8, 1>}, {pipeline_mode = #tpu.pipeline_mode<synchronous>, transform_indices = @transform_4, window_bounds = array<i64: 3, 256>}, {transform_indices = @transform_5, window_bounds = array<i64: 8, 256>}]} {
    %cst = arith.constant 0.000000e+00 : f32
    %0 = vector.broadcast %cst : f32 to vector<8x128xf32>
    %c0 = arith.constant 0 : index
    %c0_0 = arith.constant 0 : index
    %1 = vector.load %arg7[%c0, %c0_0] : memref<8x512xf32, #tpu.memory_space<vmem>>, vector<8x128xf32>
    tpu.vector_store %arg7[%c0, %c0_0], %0 {strides = array<i32>} : memref<8x512xf32, #tpu.memory_space<vmem>>, vector<8x128xf32>,
    %cst_1 = arith.constant 0.000000e+00 : f32
    %2 = vector.broadcast %cst_1 : f32 to vector<8x128xf32>
    %c0_2 = arith.constant 0 : index
    %c384 = arith.constant 384 : index
    %3 = vector.load %arg7[%c0_2, %c384] : memref<8x512xf32, #tpu.memory_space<vmem>>, vector<8x128xf32>
    tpu.vector_store %arg7[%c0_2, %c384], %2 {strides = array<i32>} : memref<8x512xf32, #tpu.memory_space<vmem>>, vector<8x128xf32>,
    %c0_3 = arith.constant 0 : index
    %c0_4 = arith.constant 0 : index
    %4 = vector.load %arg1[%c0_3, %c0_4] : memref<8x256xf32, #tpu.memory_space<vmem>>, vector<8x256xf32>
    %c0_5 = arith.constant 0 : index
    %c128 = arith.constant 128 : index
    %5 = vector.load %arg7[%c0_5, %c128] : memref<8x512xf32, #tpu.memory_space<vmem>>, vector<8x256xf32>
    tpu.vector_store %arg7[%c0_5, %c128], %4 {strides = array<i32>} : memref<8x512xf32, #tpu.memory_space<vmem>>, vector<8x256xf32>,
    %c0_6 = arith.constant 0 : index
    %c0_7 = arith.constant 0 : index
    %6 = vector.load %arg2[%c0_6, %c0_7] : memref<8x9xf32, #tpu.memory_space<vmem>>, vector<8x9xf32>
    %c0_8 = arith.constant 0 : index
    %c0_9 = arith.constant 0 : index
    %7 = vector.load %arg5[%c0_8, %c0_9] : memref<3x256xf32, #tpu.memory_space<vmem>>, vector<3x256xf32>
    %c0_10 = arith.constant 0 : index
    %c111 = arith.constant 111 : index
    %8 = vector.load %arg7[%c0_10, %c111] : memref<8x512xf32, #tpu.memory_space<vmem>>, vector<8x256xf32>
    %9 = vector.extract_strided_slice %7 {offsets = [0, 0], sizes = [1, 256], strides = [1, 1]} : vector<3x256xf32> to vector<1x256xf32>
    %10 = vector.broadcast %9 : vector<1x256xf32> to vector<8x256xf32>
    %11 = arith.mulf %8, %10 : vector<8x256xf32>
    %12 = vector.extract_strided_slice %6 {offsets = [0, 0], sizes = [8, 1], strides = [1, 1]} : vector<8x9xf32> to vector<8x1xf32>
    %13 = vector.broadcast %12 : vector<8x1xf32> to vector<8x256xf32>
    %14 = arith.mulf %11, %13 : vector<8x256xf32>
    %c0_11 = arith.constant 0 : index
    %c112 = arith.constant 112 : index
    %15 = vector.load %arg7[%c0_11, %c112] : memref<8x512xf32, #tpu.memory_space<vmem>>, vector<8x256xf32>
    %16 = vector.extract_strided_slice %6 {offsets = [0, 1], sizes = [8, 1], strides = [1, 1]} : vector<8x9xf32> to vector<8x1xf32>
    %17 = vector.broadcast %16 : vector<8x1xf32> to vector<8x256xf32>
    %18 = arith.mulf %15, %17 : vector<8x256xf32>
    %19 = arith.addf %14, %18 : vector<8x256xf32>
    %c0_12 = arith.constant 0 : index
    %c113 = arith.constant 113 : index
    %20 = vector.load %arg7[%c0_12, %c113] : memref<8x512xf32, #tpu.memory_space<vmem>>, vector<8x256xf32>
    %21 = vector.extract_strided_slice %7 {offsets = [2, 0], sizes = [1, 256], strides = [1, 1]} : vector<3x256xf32> to vector<1x256xf32>
    %22 = vector.broadcast %21 : vector<1x256xf32> to vector<8x256xf32>
    %23 = arith.mulf %20, %22 : vector<8x256xf32>
    %24 = vector.extract_strided_slice %6 {offsets = [0, 2], sizes = [8, 1], strides = [1, 1]} : vector<8x9xf32> to vector<8x1xf32>
    %25 = vector.broadcast %24 : vector<8x1xf32> to vector<8x256xf32>
    %26 = arith.mulf %23, %25 : vector<8x256xf32>
    %27 = arith.addf %19, %26 : vector<8x256xf32>
    %c0_13 = arith.constant 0 : index
    %c127 = arith.constant 127 : index
    %28 = vector.load %arg7[%c0_13, %c127] : memref<8x512xf32, #tpu.memory_space<vmem>>, vector<8x256xf32>
    %29 = vector.extract_strided_slice %7 {offsets = [0, 0], sizes = [1, 256], strides = [1, 1]} : vector<3x256xf32> to vector<1x256xf32>
    %30 = vector.broadcast %29 : vector<1x256xf32> to vector<8x256xf32>
    %31 = arith.mulf %28, %30 : vector<8x256xf32>
    %32 = vector.extract_strided_slice %6 {offsets = [0, 3], sizes = [8, 1], strides = [1, 1]} : vector<8x9xf32> to vector<8x1xf32>
    %33 = vector.broadcast %32 : vector<8x1xf32> to vector<8x256xf32>
    %34 = arith.mulf %31, %33 : vector<8x256xf32>
    %c0_14 = arith.constant 0 : index
    %c128_15 = arith.constant 128 : index
    %35 = vector.load %arg7[%c0_14, %c128_15] : memref<8x512xf32, #tpu.memory_space<vmem>>, vector<8x256xf32>
    %36 = vector.extract_strided_slice %6 {offsets = [0, 4], sizes = [8, 1], strides = [1, 1]} : vector<8x9xf32> to vector<8x1xf32>
    %37 = vector.broadcast %36 : vector<8x1xf32> to vector<8x256xf32>
    %38 = arith.mulf %35, %37 : vector<8x256xf32>
    %39 = arith.addf %34, %38 : vector<8x256xf32>
    %c0_16 = arith.constant 0 : index
    %c129 = arith.constant 129 : index
    %40 = vector.load %arg7[%c0_16, %c129] : memref<8x512xf32, #tpu.memory_space<vmem>>, vector<8x256xf32>
    %41 = vector.extract_strided_slice %7 {offsets = [2, 0], sizes = [1, 256], strides = [1, 1]} : vector<3x256xf32> to vector<1x256xf32>
    %42 = vector.broadcast %41 : vector<1x256xf32> to vector<8x256xf32>
    %43 = arith.mulf %40, %42 : vector<8x256xf32>
    %44 = vector.extract_strided_slice %6 {offsets = [0, 5], sizes = [8, 1], strides = [1, 1]} : vector<8x9xf32> to vector<8x1xf32>
    %45 = vector.broadcast %44 : vector<8x1xf32> to vector<8x256xf32>
    %46 = arith.mulf %43, %45 : vector<8x256xf32>
    %47 = arith.addf %39, %46 : vector<8x256xf32>
    %c0_17 = arith.constant 0 : index
    %c143 = arith.constant 143 : index
    %48 = vector.load %arg7[%c0_17, %c143] : memref<8x512xf32, #tpu.memory_space<vmem>>, vector<8x256xf32>
    %49 = vector.extract_strided_slice %7 {offsets = [0, 0], sizes = [1, 256], strides = [1, 1]} : vector<3x256xf32> to vector<1x256xf32>
    %50 = vector.broadcast %49 : vector<1x256xf32> to vector<8x256xf32>
    %51 = arith.mulf %48, %50 : vector<8x256xf32>
    %52 = vector.extract_strided_slice %6 {offsets = [0, 6], sizes = [8, 1], strides = [1, 1]} : vector<8x9xf32> to vector<8x1xf32>
    %53 = vector.broadcast %52 : vector<8x1xf32> to vector<8x256xf32>
    %54 = arith.mulf %51, %53 : vector<8x256xf32>
    %c0_18 = arith.constant 0 : index
    %c144 = arith.constant 144 : index
    %55 = vector.load %arg7[%c0_18, %c144] : memref<8x512xf32, #tpu.memory_space<vmem>>, vector<8x256xf32>
    %56 = vector.extract_strided_slice %6 {offsets = [0, 7], sizes = [8, 1], strides = [1, 1]} : vector<8x9xf32> to vector<8x1xf32>
    %57 = vector.broadcast %56 : vector<8x1xf32> to vector<8x256xf32>
    %58 = arith.mulf %55, %57 : vector<8x256xf32>
    %59 = arith.addf %54, %58 : vector<8x256xf32>
    %c0_19 = arith.constant 0 : index
    %c145 = arith.constant 145 : index
    %60 = vector.load %arg7[%c0_19, %c145] : memref<8x512xf32, #tpu.memory_space<vmem>>, vector<8x256xf32>
    %61 = vector.extract_strided_slice %7 {offsets = [2, 0], sizes = [1, 256], strides = [1, 1]} : vector<3x256xf32> to vector<1x256xf32>
    %62 = vector.broadcast %61 : vector<1x256xf32> to vector<8x256xf32>
    %63 = arith.mulf %60, %62 : vector<8x256xf32>
    %64 = vector.extract_strided_slice %6 {offsets = [0, 8], sizes = [8, 1], strides = [1, 1]} : vector<8x9xf32> to vector<8x1xf32>
    %65 = vector.broadcast %64 : vector<8x1xf32> to vector<8x256xf32>
    %66 = arith.mulf %63, %65 : vector<8x256xf32>
    %67 = arith.addf %59, %66 : vector<8x256xf32>
    %68 = arith.addf %27, %47 : vector<8x256xf32>
    %69 = arith.addf %68, %67 : vector<8x256xf32>
    %c0_20 = arith.constant 0 : index
    %c0_21 = arith.constant 0 : index
    %70 = vector.load %arg3[%c0_20, %c0_21] : memref<8x1xf32, #tpu.memory_space<vmem>>, vector<8x1xf32>
    %71 = vector.broadcast %70 : vector<8x1xf32> to vector<8x256xf32>
    %72 = arith.mulf %69, %71 : vector<8x256xf32>
    %c0_22 = arith.constant 0 : index
    %c0_23 = arith.constant 0 : index
    %73 = vector.load %arg4[%c0_22, %c0_23] : memref<8x1xf32, #tpu.memory_space<vmem>>, vector<8x1xf32>
    %74 = vector.broadcast %73 : vector<8x1xf32> to vector<8x256xf32>
    %75 = arith.addf %72, %74 : vector<8x256xf32>
    %cst_24 = arith.constant 0.000000e+00 : f32
    %76 = vector.broadcast %cst_24 : f32 to vector<8x256xf32>
    %77 = arith.maximumf %75, %76 : vector<8x256xf32>
    %c0_25 = arith.constant 0 : index
    %c0_26 = arith.constant 0 : index
    %78 = vector.load %arg6[%c0_25, %c0_26] : memref<8x256xf32, #tpu.memory_space<vmem>>, vector<8x256xf32>
    tpu.vector_store %arg6[%c0_25, %c0_26], %77 {strides = array<i32>} : memref<8x256xf32, #tpu.memory_space<vmem>>, vector<8x256xf32>,
    return
  }
  func.func @transform_0(%arg0: i32) -> (i32, i32) {
    %c0_i32 = arith.constant 0 : i32
    %c0_i32_0 = arith.constant 0 : i32
    return %arg0, %c0_i32 : i32, i32
  }
  func.func @transform_1(%arg0: i32) -> (i32, i32) {
    %c0_i32 = arith.constant 0 : i32
    %c0_i32_0 = arith.constant 0 : i32
    return %arg0, %c0_i32 : i32, i32
  }
  func.func @transform_2(%arg0: i32) -> (i32, i32) {
    %c0_i32 = arith.constant 0 : i32
    %c0_i32_0 = arith.constant 0 : i32
    return %arg0, %c0_i32 : i32, i32
  }
  func.func @transform_3(%arg0: i32) -> (i32, i32) {
    %c0_i32 = arith.constant 0 : i32
    %c0_i32_0 = arith.constant 0 : i32
    return %arg0, %c0_i32 : i32, i32
  }
  func.func @transform_4(%arg0: i32) -> (i32, i32) {
    %c0_i32 = arith.constant 0 : i32
    %c0_i32_0 = arith.constant 0 : i32
    %c0_i32_1 = arith.constant 0 : i32
    return %c0_i32, %c0_i32_0 : i32, i32
  }
  func.func @transform_5(%arg0: i32) -> (i32, i32) {
    %c0_i32 = arith.constant 0 : i32
    %c0_i32_0 = arith.constant 0 : i32
    return %arg0, %c0_i32 : i32, i32
  }
}

</mosaic_0001>

<bundles_post_ra>
// kernel: tpu_custom_call.1
= control target key start
LH: loop header
LB: loop body
LE: loop exit
PB: predicated region body
PF: predicated region fallthrough
CT: control target
= control target key end

     0   :  { %10 = vsyncpa [#allocation4], 0  ;;  %s636_s0 = inlined_call_operand.vmem [shape: f32[8,256], index: 0, kind: input, shape index: {}]   ;;  %s637_s1 = inlined_call_operand.hbm [shape: f32[8,9], index: 1, kind: input, shape index: {}]   ;;  %s638_s2 = inlined_call_operand.vmem [shape: f32[8,1], index: 2, kind: input, shape index: {}]   ;;  %s639_s3 = inlined_call_operand.vmem [shape: f32[8,1], index: 3, kind: input, shape index: {}]   ;;  %s640_s4 = inlined_call_operand.vmem [shape: f32[3,256], index: 4, kind: input, shape index: {}]   ;;  %s641_s5 = inlined_call_operand.hbm [shape: f32[8,256], index: 5, kind: output, shape index: {}]  }
   0x1   :  { %11 = vsyncpa [#allocation5], 0  ;;  %s483_s18 = smov [#allocation3]  }
   0x2   :  { %s20_s19 = sshll.u32 %s483_s18, 4  ;;  %s21_s19 = int_to_ptr.vmem [resolvable:$true] %s20_s19 }
   0x3   :  { %s447_s20 = scalar_lea.vmem %s21_s19, 128  ;;  %p452_p1 = scmp.lt.s32.totalorder %s21_s19, %s21_s19 }
   0x4   :  { %p448_p0 = scmp.ne.s32.totalorder %s21_s19, %s447_s20  ;;  %p453_p2 = scmp.lt.s32.totalorder %s447_s20, %s447_s20 }
   0x6   :  { %p454_p3 = por %p453_p2, %p452_p1 }
   0x8   :  { %p455_p4 = pnand %p454_p3, %p448_p0 }
   0xa   :  { %458 = shalt.err (!%p455_p4)
}
   0xb   :  { %23 = dma.hbm_to_vmem [thread:$0]  %s637_s1, 128, %s21_s19, [#allocation4]  }
   0xc   :  { %479 = dma.done.wait [#allocation4], 128  }
   0xd   :  { %480 = vsyncadd [#allocation4], 4294967168  ;;  %v45_v0 = vlaneseq  ;;  %v484_v1 = vmov 7   ;;  %v485_v2 = vmov 4   ;;  %v536_v6 = vld [vmem:[#allocation3] sm:$0xff]  ;;  %v486_v11 = vmov 5  }
   0xe   :  { %431 = vset.pattern.permute.xlu1 %v484_v1  ;;  %429 = vset.pattern.permute.xlu0 %v485_v2  ;;  %v40_v7 = vld [vmem:[%s640_s4] sm:$0x77]  ;;  %s487_s1 = smov 1   ;;  %v488_v13 = vmov 3   ;;  %v489_v15 = vmov 8   ;;  %s490_s4 = smov 17  }
   0xf   :  { %v46_v3 = vshrl.u32 %v45_v0, 7  ;;  %263 = vperm.xlu1 %431, %v536_v6   ;;  %186 = vperm.xlu0 %429, %v536_v6   ;;  %v491_v17 = vmov 1   ;;  %s492_s25 = smov 127   ;;  %v493_v20 = vmov 6   ;;  %v494_v22 = vmov 2   ;;  %s495_s26 = smov 15  }
  0x10   :  { %v496_v24 = vmov 0   ;;  %s497_s27 = smov 113   ;;  %v564_v25 = vld [vmem:[%s636_s0] sm:$0xff]  ;;  %v569_v26 = vld [vmem:[%s636_s0 + $0x8] sm:$0xff]  ;;  %vm211_vm0 = vcmask 7168   ;;  %s498_s0 = smov 126  }
  0x11   :  { %v112_v4 = vsub.s32 2, %v46_v3  ;;  %v116_v5 = vsub.s32 6, %v46_v3  ;;  %v47_v14 = vsub.s32 0, %v46_v3  ;;  %v51_v19 = vsub.s32 4, %v46_v3  ;;  %s499_s7 = smov 111   ;;  %v358_v3 = vld [vmem:[%s638_s2] sm:$0xff] }
  0x12   :  { %vm290_vm1 = vcmask 138240   ;;  %vm101_vm2 = vcmask 1039360   ;;  %vm134_vm3 = vcmask 924672   ;;  %s500_s2 = smov 112   ;;  %vm158_vm4 = vcmask 1031168   ;;  %s501_s10 = smov 96  }
  0x13   :  { %v113_v8 = vrot.slane %v40_v7, %v112_v4  ;;  %v117_v9 = vrot.slane %v40_v7, %v116_v5  ;;  %430 = vset.pattern.permute.xlu0 %v486_v11  ;;  %434 = vset.pattern.permute.xlu1 %v488_v13  ;;  %v48_v16 = vrot.slane %v40_v7, %v47_v14  ;;  %vm247_vm5 = vcmask 121856  }
  0x14   :  { %220 = vperm.xlu0 %430, %v536_v6   ;;  %v52_v21 = vrot.slane %v40_v7, %v51_v19  ;;  %vm69_vm6 = vcmask 908288   ;;  %vm331_vm7 = vcmask 916480   ;;  %vm349_vm8 = vcmask 785408  }
  0x15   :  { %v123_v10 = vrot.slane %v113_v8, %v112_v4  ;;  %v127_v12 = vrot.slane %v117_v9, %v112_v4  ;;  %v547_v18 = vrot.slane %v48_v16, %v47_v14 }
  0x16   :  { %v555_v23 = vrot.slane %v52_v21, %v47_v14 }
  0x17   :  { %207 = vrot.lane.b32.xlu1 %v123_v10, %s487_s1 }
  0x18   :  { %432 = vset.pattern.permute.xlu0 %v489_v15 }
  0x19   :  { %299 = vperm.xlu0 %432, %v536_v6  }
  0x1b   :  { %209 = vrot.lane.b32.xlu1 %v127_v12, %s487_s1 }
  0x1d   :  { %433 = vset.pattern.permute.xlu0 %v491_v17 }
  0x1e   :  { %86 = vperm.xlu0 %433, %v536_v6  }
  0x1f   :  { %286 = vrot.lane.b32.xlu1 %v123_v10, %s490_s4 }
  0x22   :  { %167 = vrot.lane.b32.xlu0 %v547_v18, %s492_s25 }
  0x23   :  { %288 = vrot.lane.b32.xlu1 %v127_v12, %s490_s4  ;;  %436 = vset.pattern.permute.xlu0 %v493_v20 }
  0x26   :  { %256 = vperm.xlu0 %436, %v536_v6  }
  0x27   :  { %179 = vperm.xlu1 %434, %v536_v6  }
  0x2a   :  { %243 = vrot.lane.b32.xlu0 %v547_v18, %s495_s26 }
  0x2b   :  { %435 = vset.pattern.permute.xlu1 %v494_v22  ;;  %438 = vset.pattern.permute.xlu0 %v496_v24 }
  0x2c   :  { %143 = vperm.xlu1 %435, %v536_v6  }
  0x30   :  { %169 = vrot.lane.b32.xlu1 %v555_v23, %s492_s25 }
  0x31   :  { %437 = vset.pattern.permute.xlu1 %v496_v24 }
  0x34   :  { %130 = vrot.lane.b32.xlu1 %v123_v10, %s497_s27 }
  0x38   :  { %132 = vrot.lane.b32.xlu1 %v127_v12, %s497_s27 }
  0x3c   :  { %245 = vrot.lane.b32.xlu1 %v555_v23, %s495_s26 }
  0x8a   :  { %v264_v27 = vpop.permute.xlu1 %263  ;;  %v187_v28 = vpop.permute.xlu0 %186 }
  0x8b   :  { %v189_v29 = vmul.f32 %v187_v28, %v564_v25  ;;  %v190_v30 = vmul.f32 %v187_v28, %v569_v26  ;;  %v267_v44 = vmul.f32 %v264_v27, %v569_v26  ;;  %v266_v45 = vmul.f32 %v264_v27, %v564_v25 }
  0x8c   :  { %v268_v50 = vmul.f32 0.0, %v264_v27 }
  0x8d   :  { %193 = vrot.lane.b32.xlu0 %v189_v29, %s492_s25  ;;  %195 = vrot.lane.b32.xlu1 %v190_v30, %s492_s25 }
  0x8e   :  { %v208_v31 = vpop.permute.xlu1 %207 }
  0x8f   :  { %v216_v32 = vmul.f32 %v208_v31, %v564_v25  ;;  %v221_v33 = vpop.permute.xlu0 %220 }
  0x91   :  { %v223_v34 = vmul.f32 %v221_v33, %v216_v32 }
  0x92   :  { %v210_v35 = vpop.permute.xlu1 %209 }
  0x93   :  { %v212_v36 = vsel %vm211_vm0, %v208_v31, %v210_v35  ;;  %v218_v37 = vmul.f32 0.0, %v210_v35  ;;  %229 = vrot.lane.b32.xlu0 %v223_v34, %s498_s0 }
  0x94   :  { %v217_v38 = vmul.f32 %v212_v36, %v569_v26  ;;  %v300_v43 = vpop.permute.xlu0 %299 }
  0x95   :  { %v225_v39 = vmul.f32 %v221_v33, %v218_v37 }
  0x96   :  { %v287_v40 = vpop.permute.xlu1 %286  ;;  %v224_v41 = vmul.f32 %v221_v33, %v217_v38 }
  0x97   :  { %v295_v42 = vmul.f32 %v287_v40, %v564_v25  ;;  %233 = vrot.lane.b32.xlu0 %v225_v39, %s498_s0 }
  0x98   :  { %231 = vrot.lane.b32.xlu1 %v224_v41, %s498_s0 }
  0x99   :  { %v302_v48 = vmul.f32 %v300_v43, %v295_v42  ;;  %v87_v53 = vpop.permute.xlu0 %86 }
  0x9a   :  { %v289_v46 = vpop.permute.xlu1 %288  ;;  %v89_v58 = vmul.f32 0.0, %v87_v53  ;;  %v91_v0 = vmul.f32 %v87_v53, %v569_v26  ;;  %v90_v5 = vmul.f32 %v87_v53, %v564_v25 }
  0x9b   :  { %v291_v47 = vsel %vm290_vm1, %v287_v40, %v289_v46  ;;  %274 = vrot.lane.b32.xlu0 %v267_v44, %s492_s25  ;;  %v297_v49 = vmul.f32 0.0, %v289_v46 }
  0x9c   :  { %272 = vrot.lane.b32.xlu1 %v266_v45, %s492_s25  ;;  %v296_v51 = vmul.f32 %v291_v47, %v569_v26 }
  0x9d   :  { %v304_v54 = vmul.f32 %v300_v43, %v297_v49  ;;  %v168_v57 = vpop.permute.xlu0 %167 }
  0x9e   :  { %v303_v55 = vmul.f32 %v300_v43, %v296_v51  ;;  %v175_v15 = vmul.f32 0.0, %v168_v57 }
  0x9f   :  { %308 = vrot.lane.b32.xlu0 %v302_v48, %s498_s0 }
  0xa0   :  { %276 = vrot.lane.b32.xlu1 %v268_v50, %s492_s25 }
  0xa1   :  { %v257_v13 = vpop.permute.xlu0 %256 }
  0xa2   :  { %v180_v52 = vpop.permute.xlu1 %179 }
  0xa3   :  { %312 = vrot.lane.b32.xlu0 %v304_v54, %s498_s0 }
  0xa4   :  { %310 = vrot.lane.b32.xlu1 %v303_v55, %s498_s0 }
  0xa5   :  { %v244_v14 = vpop.permute.xlu0 %243 }
  0xa6   :  { %v252_v37 = vmul.f32 %v244_v14, %v564_v25 }
  0xa7   :  { %v144_v56 = vpop.permute.xlu1 %143  ;;  %65 = vrot.lane.b32.xlu0 %v547_v18, %s499_s7  ;;  %v182_v18 = vmul.f32 %v180_v52, %v175_v15 }
  0xa8   :  { %79 = vperm.xlu1 %437, %v536_v6   ;;  %v259_v44 = vmul.f32 %v257_v13, %v252_v37 }
  0xab   :  { %v170_v59 = vpop.permute.xlu1 %169  ;;  %95 = vrot.lane.b32.xlu0 %v89_v58, %s492_s25 }
  0xac   :  { %v177_v60 = vmul.f32 %v170_v59, %v569_v26  ;;  %v171_v61 = vsel %vm101_vm2, %v168_v57, %v170_v59  ;;  %67 = vrot.lane.b32.xlu1 %v555_v23, %s499_s7 }
  0xad   :  { %v176_v62 = vmul.f32 %v171_v61, %v564_v25 }
  0xae   :  { %v184_v63 = vmul.f32 %v180_v52, %v177_v60 }
  0xaf   :  { %v131_v1 = vpop.permute.xlu1 %130  ;;  %v183_v2 = vmul.f32 %v180_v52, %v176_v62  ;;  %99 = vrot.lane.b32.xlu0 %v91_v0, %s492_s25 }
  0xb0   :  { %361 = vperm.xlu1 %437, %v358_v3   ;;  %v139_v6 = vmul.f32 0.0, %v131_v1 }
  0xb2   :  { %v146_v10 = vmul.f32 %v144_v56, %v139_v6 }
  0xb3   :  { %v133_v4 = vpop.permute.xlu1 %132 }
  0xb4   :  { %v135_v7 = vsel %vm134_vm3, %v131_v1, %v133_v4  ;;  %97 = vrot.lane.b32.xlu1 %v90_v5, %s492_s25  ;;  %v141_v11 = vmul.f32 %v133_v4, %v569_v26 }
  0xb5   :  { %v140_v8 = vmul.f32 %v135_v7, %v564_v25 }
  0xb6   :  { %v148_v12 = vmul.f32 %v144_v56, %v141_v11 }
  0xb7   :  { %v147_v9 = vmul.f32 %v144_v56, %v140_v8  ;;  %v246_v16 = vpop.permute.xlu1 %245  ;;  %v367_v56 = vld [vmem:[%s639_s3] sm:$0xff]  ;;  %s502_s3 = smov [#allocation6]  }
  0xb8   :  { %152 = vrot.lane.b32.xlu1 %v146_v10, %s498_s0  ;;  %v248_v34 = vsel %vm247_vm5, %v244_v14, %v246_v16  ;;  %v254_v40 = vmul.f32 0.0, %v246_v16  ;;  %s400_s13 = sshll.u32 %s502_s3, 4  ;;  %s401_s13 = int_to_ptr.vmem [resolvable:$true] %s400_s13 }
  0xb9   :  { %154 = vrot.lane.b32.xlu0 %v147_v9, %s498_s0  ;;  %v253_v38 = vmul.f32 %v248_v34, %v569_v26  ;;  %s459_s14 = scalar_lea.vmem %s401_s13, 256  ;;  %p464_p6 = scmp.lt.s32.totalorder %s401_s13, %s401_s13 }
  0xba   :  { %v261_v48 = vmul.f32 %v257_v13, %v254_v40  ;;  %p460_p5 = scmp.ne.s32.totalorder %s401_s13, %s459_s14  ;;  %p465_p7 = scmp.lt.s32.totalorder %s459_s14, %s459_s14 }
  0xbb   :  { %v260_v45 = vmul.f32 %v257_v13, %v253_v38 }
  0xbc   :  { %156 = vrot.lane.b32.xlu1 %v148_v12, %s498_s0  ;;  %p466_p8 = por %p465_p7, %p464_p6 }
  0xbe   :  { %p467_p9 = pnand %p466_p8, %p460_p5 }
  0xff   :  { %v194_v17 = vpop.permute.xlu0 %193  ;;  %v196_v19 = vpop.permute.xlu1 %195 }
 0x100   :  { %v201_v20 = vadd.f32 %v194_v17, %v182_v18  ;;  %v197_v23 = vsel %vm101_vm2, %v194_v17, %v196_v19  ;;  %v203_v27 = vadd.f32 %v196_v19, %v184_v63 }
 0x101   :  { %v202_v28 = vadd.f32 %v197_v23, %v183_v2 }
 0x105   :  { %v230_v21 = vpop.permute.xlu0 %229 }
 0x106   :  { %v240_v22 = vadd.f32 %v230_v21, %v201_v20 }
 0x108   :  { %325 = vrot.lane.b32.xlu0 %v240_v22, %s500_s2 }
 0x109   :  { %v234_v24 = vpop.permute.xlu0 %233 }
 0x10a   :  { %v232_v29 = vpop.permute.xlu1 %231 }
 0x10b   :  { %v235_v30 = vsel %vm158_vm4, %v230_v21, %v232_v29  ;;  %v236_v31 = vsel %vm158_vm4, %v232_v29, %v234_v24 }
 0x10c   :  { %v241_v32 = vadd.f32 %v235_v30, %v202_v28  ;;  %v242_v33 = vadd.f32 %v236_v31, %v203_v27 }
 0x10d   :  { %v275_v35 = vpop.permute.xlu0 %274 }
 0x10e   :  { %v273_v36 = vpop.permute.xlu1 %272  ;;  %329 = vrot.lane.b32.xlu0 %v242_v33, %s500_s2  ;;  %327 = vrot.lane.b32.xlu1 %v241_v32, %s500_s2 }
 0x10f   :  { %v278_v42 = vsel %vm101_vm2, %v273_v36, %v275_v35 }
 0x110   :  { %v283_v47 = vadd.f32 %v278_v42, %v259_v44 }
 0x111   :  { %v309_v39 = vpop.permute.xlu0 %308 }
 0x112   :  { %v277_v41 = vpop.permute.xlu1 %276 }
 0x113   :  { %v279_v43 = vsel %vm101_vm2, %v275_v35, %v277_v41  ;;  %v285_v53 = vadd.f32 %v277_v41, %v261_v48 }
 0x114   :  { %v284_v49 = vadd.f32 %v279_v43, %v260_v45 }
 0x115   :  { %v313_v46 = vpop.permute.xlu0 %312 }
 0x116   :  { %v311_v50 = vpop.permute.xlu1 %310  ;;  %v321_v57 = vadd.f32 %v313_v46, %v285_v53 }
 0x117   :  { %v314_v51 = vsel %vm158_vm4, %v309_v39, %v311_v50  ;;  %v315_v52 = vsel %vm158_vm4, %v311_v50, %v313_v46 }
 0x118   :  { %v319_v54 = vadd.f32 %v314_v51, %v283_v47  ;;  %v320_v55 = vadd.f32 %v315_v52, %v284_v49 }
 0x119   :  { %v66_v60 = vpop.permute.xlu0 %65 }
 0x11a   :  { %343 = vrot.lane.b32.xlu0 %v319_v54, %s501_s10  ;;  %345 = vrot.lane.b32.xlu1 %v320_v55, %s501_s10  ;;  %v74_v4 = vmul.f32 0.0, %v66_v60 }
 0x11d   :  { %v96_v62 = vpop.permute.xlu0 %95 }
 0x11e   :  { %347 = vrot.lane.b32.xlu0 %v321_v57, %s501_s10  ;;  %370 = vperm.xlu1 %437, %v367_v56  }
 0x121   :  { %v100_v0 = vpop.permute.xlu0 %99 }
 0x123   :  { %v80_v58 = vpop.permute.xlu1 %79 }
 0x124   :  { %v82_v9 = vmul.f32 %v80_v58, %v74_v4 }
 0x127   :  { %v68_v59 = vpop.permute.xlu1 %67 }
 0x128   :  { %v70_v3 = vsel %vm69_vm6, %v66_v60, %v68_v59  ;;  %v76_v7 = vmul.f32 %v68_v59, %v569_v26 }
 0x129   :  { %v75_v5 = vmul.f32 %v70_v3, %v564_v25 }
 0x12a   :  { %v84_v14 = vmul.f32 %v80_v58, %v76_v7 }
 0x12b   :  { %v362_v61 = vpop.permute.xlu1 %361  ;;  %v155_v2 = vpop.permute.xlu0 %154  ;;  %v83_v10 = vmul.f32 %v80_v58, %v75_v5 }
 0x12c   :  { %v109_v20 = vadd.f32 %v100_v0, %v84_v14 }
 0x12f   :  { %v98_v63 = vpop.permute.xlu1 %97 }
 0x130   :  { %v102_v12 = vsel %vm101_vm2, %v96_v62, %v98_v63  ;;  %v103_v13 = vsel %vm101_vm2, %v98_v63, %v100_v0 }
 0x131   :  { %v107_v16 = vadd.f32 %v102_v12, %v82_v9  ;;  %v108_v17 = vadd.f32 %v103_v13, %v83_v10 }
 0x133   :  { %v153_v1 = vpop.permute.xlu1 %152 }
 0x134   :  { %v159_v19 = vsel %vm158_vm4, %v153_v1, %v155_v2 }
 0x135   :  { %v164_v23 = vadd.f32 %v159_v19, %v107_v16 }
 0x137   :  { %v157_v8 = vpop.permute.xlu1 %156 }
 0x138   :  { %v160_v25 = vsel %vm158_vm4, %v155_v2, %v157_v8  ;;  %v166_v29 = vadd.f32 %v157_v8, %v109_v20 }
 0x139   :  { %v165_v24 = vadd.f32 %v160_v25, %v108_v17 }
 0x17a   :  { %v326_v6 = vpop.permute.xlu0 %325 }
 0x180   :  { %v330_v11 = vpop.permute.xlu0 %329  ;;  %v328_v15 = vpop.permute.xlu1 %327 }
 0x181   :  { %v332_v21 = vsel %vm331_vm7, %v326_v6, %v328_v15  ;;  %v333_v22 = vsel %vm331_vm7, %v328_v15, %v330_v11  ;;  %v339_v33 = vadd.f32 %v330_v11, %v166_v29 }
 0x182   :  { %v337_v30 = vadd.f32 %v332_v21, %v164_v23  ;;  %v338_v31 = vadd.f32 %v333_v22, %v165_v24 }
 0x18c   :  { %v344_v18 = vpop.permute.xlu0 %343  ;;  %v346_v26 = vpop.permute.xlu1 %345 }
 0x18d   :  { %v350_v28 = vsel %vm349_vm8, %v344_v18, %v346_v26  ;;  %v355_v34 = vadd.f32 %v344_v18, %v337_v30 }
 0x18e   :  { %v356_v35 = vadd.f32 %v350_v28, %v338_v31 }
 0x18f   :  { %v364_v37 = vmul.f32 %v362_v61, %v355_v34 }
 0x190   :  { %v348_v27 = vpop.permute.xlu0 %347  ;;  %v365_v38 = vmul.f32 %v362_v61, %v356_v35 }
 0x191   :  { %v351_v32 = vsel %vm349_vm8, %v346_v26, %v348_v27 }
 0x192   :  { %v357_v36 = vadd.f32 %v351_v32, %v339_v33 }
 0x194   :  { %v366_v40 = vmul.f32 %v362_v61, %v357_v36 }
 0x199   :  { %v371_v39 = vpop.permute.xlu1 %370 }
 0x19a   :  { %v373_v41 = vadd.f32 %v371_v39, %v364_v37  ;;  %v374_v42 = vadd.f32 %v371_v39, %v365_v38  ;;  %v375_v43 = vadd.f32 %v371_v39, %v366_v40 }
 0x19c   :  { %v377_v44 = vmax.f32 %v374_v42, 0.0  ;;  %v376_v45 = vmax.f32 %v373_v41, 0.0  ;;  %v378_v46 = vmax.f32 %v375_v43, 0.0 }
 0x19e   :  { %384 = vrot.lane.b32.xlu1 %v377_v44, %s490_s4  ;;  %382 = vrot.lane.b32.xlu0 %v376_v45, %s490_s4 }
 0x1a2   :  { %386 = vrot.lane.b32.xlu0 %v378_v46, %s490_s4 }
 0x210   :  { %v385_v47 = vpop.permute.xlu1 %384  ;;  %v383_v48 = vpop.permute.xlu0 %382 }
 0x211   :  { %v388_v49 = vsel %vm290_vm1, %v383_v48, %v385_v47 }
 0x212   :  { %392 = vst [vmem:[#allocation6] sm:$0xff] %v388_v49 }
 0x214   :  { %v387_v50 = vpop.permute.xlu0 %386 }
 0x215   :  { %v389_v51 = vsel %vm290_vm1, %v385_v47, %v387_v50 }
 0x216   :  { %393 = vst [vmem:[#allocation6 + $0x8] sm:$0xff] %v389_v51 }
 0x217   :  { %470 = shalt.err (!%p467_p9)
}
 0x218   :  { %403 = dma.vmem_to_hbm [thread:$0]  %s401_s13, 256, %s641_s5, [#allocation5]  }
 0x219   :  { %481 = dma.done.wait [#allocation5], 256  }
 0x21a   :  { %482 = vsyncadd [#allocation5], 4294967040 }
 0x21b   :  { %407 = vsyncpa [#allocation4], 1 }
 0x21c   :  { %408 = vsyncpa [#allocation5], 1 }

</bundles_post_ra>
